<compile_context>
chip_gen: v6e
topology: v6e:2x2x1
jax: 0.10.0
libtpu: 0.0.40
codegen_flags: <defaults>
</compile_context>

<pallas_src>
import functools

import numpy as np
import jax
import jax.numpy as jnp
from jax.experimental import pallas as pl
from jax.experimental.pallas import tpu as pltpu


def _round_up(x: int, m: int) -> int:
    return ((x + m - 1) // m) * m


# ----------------------------- bicubic resize --------------------------------
def _bicubic_matrix(in_size: int, out_size: int) -> np.ndarray:
    """Dense (out_size, in_size) interpolation matrix reproducing PyTorch
    F.interpolate(mode='bicubic', align_corners=False): A = -0.75, half-pixel
    source coords, taps clamped to [0, in_size-1]."""
    A = -0.75
    scale = in_size / out_size
    dst = np.arange(out_size)
    src = scale * (dst + 0.5) - 0.5
    x0 = np.floor(src).astype(np.int64)
    t = src - x0

    def cc1(x):  # |x| <= 1
        return ((A + 2.0) * x - (A + 3.0)) * x * x + 1.0

    def cc2(x):  # 1 < |x| < 2
        return ((A * x - 5.0 * A) * x + 8.0 * A) * x - 4.0 * A

    w = np.stack([cc2(t + 1.0), cc1(t), cc1(1.0 - t), cc2(2.0 - t)], axis=1)
    M = np.zeros((out_size, in_size), dtype=np.float64)
    for k in range(4):
        idx = np.clip(x0 - 1 + k, 0, in_size - 1)
        np.add.at(M, (dst, idx), w[:, k])
    return M.astype(np.float32)


def _resize_kernel(x_ref, mh_ref, mwt_ref, o_ref):
    # x_ref: (1, C, Hin, Win)  mh: (Ho, Hin)  mwt: (Win, Wo)  o: (1, C, Ho, Wo)
    c = x_ref.shape[1]
    for ci in range(c):
        t = jnp.dot(mh_ref[...], x_ref[0, ci], preferred_element_type=jnp.float32)
        o_ref[0, ci] = jnp.dot(t, mwt_ref[...], preferred_element_type=jnp.float32)


def bicubic_resize_pallas(x_nchw, out_h, out_w):
    n, c, hin, win = x_nchw.shape
    mh = jnp.asarray(_bicubic_matrix(hin, out_h))
    mwt = jnp.asarray(_bicubic_matrix(win, out_w)).T
    return pl.pallas_call(
        _resize_kernel,
        out_shape=jax.ShapeDtypeStruct((n, c, out_h, out_w), jnp.float32),
        grid=(n,),
        in_specs=[
            pl.BlockSpec((1, c, hin, win), lambda i: (i, 0, 0, 0)),
            pl.BlockSpec((out_h, hin), lambda i: (0, 0)),
            pl.BlockSpec((win, out_w), lambda i: (0, 0)),
        ],
        out_specs=pl.BlockSpec((1, c, out_h, out_w), lambda i: (i, 0, 0, 0)),
        compiler_params=pltpu.CompilerParams(dimension_semantics=("parallel",)),
    )(x_nchw, mh, mwt)


# -------------------------- conv tiling / layout glue -------------------------
def _conv_tiles(x_nchw, pad, ksize, tile_m):
    """Zero-pad spatially, flatten rows at stride Wp, and build halo-duplicated
    M-tiles of shape (N, T, C, tile_m + halo).  The conv kernel then produces
    outputs at flat index m = h*Wp + w (junk at w >= W is sliced off later)."""
    n, c, h, w = x_nchw.shape
    hp, wp = h + 2 * pad, w + 2 * pad
    halo = (ksize - 1) * (wp + 1)          # max tap offset ky*Wp + kx
    halo_r = _round_up(max(halo, 1), 128)  # lane-align the tile tail
    m_out = h * wp                          # flat output length (incl. junk cols)
    tile_m = min(_round_up(tile_m, 128), _round_up(m_out, 128))
    n_tiles = (m_out + tile_m - 1) // tile_m
    tile_in = tile_m + halo_r
    l_pad = n_tiles * tile_m + halo_r       # >= hp*wp always (since halo >= 2*pad*wp)

    xp = jnp.pad(x_nchw, ((0, 0), (0, 0), (pad, pad), (pad, pad)))
    xflat = xp.reshape(n, c, hp * wp)
    xflat = jnp.pad(xflat, ((0, 0), (0, 0), (0, l_pad - hp * wp)))
    idx = jnp.arange(n_tiles)[:, None] * tile_m + jnp.arange(tile_in)[None, :]
    tiles = jnp.take(xflat, idx, axis=2)            # (N, C, T, tile_in)
    tiles = jnp.transpose(tiles, (0, 2, 1, 3))      # (N, T, C, tile_in)
    meta = dict(n=n, h=h, w=w, wp=wp, tile_m=tile_m, n_tiles=n_tiles,
                tile_in=tile_in, halo=halo)
    return tiles, meta


def _conv_extract(out_flat, meta):
    # (N, Cout, T*tile_m) -> (N, Cout, H, W): drop junk columns / tail padding.
    n, h, w, wp = meta["n"], meta["h"], meta["w"], meta["wp"]
    cout = out_flat.shape[1]
    return out_flat[:, :, :h * wp].reshape(n, cout, h, wp)[:, :, :, :w]


# ------------------------------ conv kernels ----------------------------------
def _conv1_conv2_kernel(x_ref, w1_ref, b1_ref, w2_ref, b2_ref, o_ref, *,
                        ksize, wp, tile_m):
    # x_ref: (1, 1, Cin, tile_in) -- channels-first flat slab (spatial on lanes)
    # w1_ref: (k*k, Cmid, Cin)  b1: (Cmid, 1)  w2: (Cout, Cmid)  b2: (Cout, 1)
    x = x_ref[0, 0]                                        # (Cin, tile_in)
    c_mid = w1_ref.shape[1]
    acc = jnp.zeros((c_mid, tile_m), jnp.float32)
    for ky in range(ksize):
        for kx in range(ksize):
            off = ky * wp + kx                             # static flat tap offset
            acc = acc + jnp.dot(w1_ref[ky * ksize + kx], x[:, off:off + tile_m],
                                preferred_element_type=jnp.float32)
    hid = jnp.maximum(acc + b1_ref[...], 0.0)              # conv1 bias + ReLU
    out = jnp.dot(w2_ref[...], hid, preferred_element_type=jnp.float32)
    o_ref[0] = jnp.maximum(out + b2_ref[...], 0.0)         # fused 1x1 conv2 + ReLU


def _conv_kernel(x_ref, w_ref, b_ref, o_ref, *, ksize, wp, tile_m, relu):
    x = x_ref[0, 0]                                        # (Cin, tile_in)
    c_out = w_ref.shape[1]
    acc = jnp.zeros((c_out, tile_m), jnp.float32)
    for ky in range(ksize):
        for kx in range(ksize):
            off = ky * wp + kx
            acc = acc + jnp.dot(w_ref[ky * ksize + kx], x[:, off:off + tile_m],
                                preferred_element_type=jnp.float32)
    acc = acc + b_ref[...]
    if relu:
        acc = jnp.maximum(acc, 0.0)
    o_ref[0] = acc


def conv1_conv2_fused_pallas(x_nchw, w1_oihw, b1, w2_oihw, b2, *, pad, tile_m=512):
    ksize = w1_oihw.shape[-1]
    c_in = w1_oihw.shape[1]
    c_mid = w1_oihw.shape[0]
    c_out = w2_oihw.shape[0]

    # Pad the reduction (channel) dim to a multiple of 8 (zeros -> numerics unchanged).
    c_in_p = _round_up(c_in, 8)
    if c_in_p != c_in:
        x_nchw = jnp.pad(x_nchw, ((0, 0), (0, c_in_p - c_in), (0, 0), (0, 0)))
    tiles, meta = _conv_tiles(x_nchw, pad, ksize, tile_m)
    n, t, tile_in, tm = meta["n"], meta["n_tiles"], meta["tile_in"], meta["tile_m"]

    w1t = jnp.transpose(w1_oihw, (2, 3, 0, 1)).reshape(ksize * ksize, c_mid, c_in)
    if c_in_p != c_in:
        w1t = jnp.pad(w1t, ((0, 0), (0, 0), (0, c_in_p - c_in)))
    w2m = w2_oihw.reshape(c_out, c_mid)
    b1c = b1.reshape(c_mid, 1)
    b2c = b2.reshape(c_out, 1)

    m_pad = t * tm
    flops = 2 * n * m_pad * (ksize * ksize * c_in_p * c_mid + c_mid * c_out)
    bytes_accessed = 4 * (tiles.size + w1t.size + w2m.size + b1c.size + b2c.size
                          + n * c_out * m_pad)

    out = pl.pallas_call(
        functools.partial(_conv1_conv2_kernel, ksize=ksize, wp=meta["wp"], tile_m=tm),
        out_shape=jax.ShapeDtypeStruct((n, c_out, m_pad), jnp.float32),
        grid=(n, t),
        in_specs=[
            pl.BlockSpec((1, 1, c_in_p, tile_in), lambda i, j: (i, j, 0, 0)),
            pl.BlockSpec((ksize * ksize, c_mid, c_in_p), lambda i, j: (0, 0, 0)),
            pl.BlockSpec((c_mid, 1), lambda i, j: (0, 0)),
            pl.BlockSpec((c_out, c_mid), lambda i, j: (0, 0)),
            pl.BlockSpec((c_out, 1), lambda i, j: (0, 0)),
        ],
        out_specs=pl.BlockSpec((1, c_out, tm), lambda i, j: (i, 0, j)),
        compiler_params=pltpu.CompilerParams(
            dimension_semantics=("parallel", "parallel")),
        cost_estimate=pl.CostEstimate(flops=flops, transcendentals=0,
                                      bytes_accessed=bytes_accessed),
    )(tiles, w1t, b1c, w2m, b2c)
    return _conv_extract(out, meta)


def conv2d_pallas(x_nchw, w_oihw, b, *, pad, relu, tile_m=512):
    ksize = w_oihw.shape[-1]
    c_in = w_oihw.shape[1]
    c_out = w_oihw.shape[0]

    c_in_p = _round_up(c_in, 8)
    if c_in_p != c_in:
        x_nchw = jnp.pad(x_nchw, ((0, 0), (0, c_in_p - c_in), (0, 0), (0, 0)))
    tiles, meta = _conv_tiles(x_nchw, pad, ksize, tile_m)
    n, t, tile_in, tm = meta["n"], meta["n_tiles"], meta["tile_in"], meta["tile_m"]

    wt = jnp.transpose(w_oihw, (2, 3, 0, 1)).reshape(ksize * ksize, c_out, c_in)
    if c_in_p != c_in:
        wt = jnp.pad(wt, ((0, 0), (0, 0), (0, c_in_p - c_in)))
    bc = b.reshape(c_out, 1)

    m_pad = t * tm
    flops = 2 * n * m_pad * ksize * ksize * c_in_p * c_out
    bytes_accessed = 4 * (tiles.size + wt.size + bc.size + n * c_out * m_pad)

    out = pl.pallas_call(
        functools.partial(_conv_kernel, ksize=ksize, wp=meta["wp"], tile_m=tm,
                          relu=relu),
        out_shape=jax.ShapeDtypeStruct((n, c_out, m_pad), jnp.float32),
        grid=(n, t),
        in_specs=[
            pl.BlockSpec((1, 1, c_in_p, tile_in), lambda i, j: (i, j, 0, 0)),
            pl.BlockSpec((ksize * ksize, c_out, c_in_p), lambda i, j: (0, 0, 0)),
            pl.BlockSpec((c_out, 1), lambda i, j: (0, 0)),
        ],
        out_specs=pl.BlockSpec((1, c_out, tm), lambda i, j: (i, 0, j)),
        compiler_params=pltpu.CompilerParams(
            dimension_semantics=("parallel", "parallel")),
        cost_estimate=pl.CostEstimate(flops=flops, transcendentals=0,
                                      bytes_accessed=bytes_accessed),
    )(tiles, wt, bc)
    return _conv_extract(out, meta)


# ------------------------------- module glue ----------------------------------
def init_params(key):
    def init_conv(k, ksize, cin, cout):
        wkey, bkey = jax.random.split(k)
        bound = 1.0 / np.sqrt(cin * ksize * ksize)
        w = jax.random.uniform(wkey, (cout, cin, ksize, ksize), jnp.float32,
                               -bound, bound)             # OIHW, like PyTorch
        bb = jax.random.uniform(bkey, (cout,), jnp.float32, -bound, bound)
        return w, bb

    k1, k2, k3 = jax.random.split(key, 3)
    return {
        "conv1": init_conv(k1, 9, 3, 64),   # Conv2d(3, 64, k=9, pad=4)
        "conv2": init_conv(k2, 1, 64, 32),  # Conv2d(64, 32, k=1, pad=0)
        "conv3": init_conv(k3, 5, 32, 3),   # Conv2d(32, 3, k=5, pad=2)
    }


def strange_super_resolution_forward(params, x_nchw, size_tensor, *, tile_m=512):
    # tile_m: spatial tile of the flattened (H * padded-W) axis.  Safe everywhere at
    # 512; raise towards 1024-2048 on v5e/v6e (128 MiB VMEM) and keep <=2048 on v7x.
    out_h, out_w = size_tensor.shape[-2], size_tensor.shape[-1]
    xr = bicubic_resize_pallas(x_nchw, out_h, out_w)         # (N, 3, Ho, Wo) NCHW
    w1, b1 = params["conv1"]
    w2, b2 = params["conv2"]
    w3, b3 = params["conv3"]
    h = conv1_conv2_fused_pallas(xr, w1, b1, w2, b2, pad=4, tile_m=tile_m)
    out = conv2d_pallas(h, w3, b3, pad=2, relu=False, tile_m=tile_m)
    return out                                                # already NCHW


def _reference_forward(params, x_nchw, size_tensor):
    """Pure-JAX reference (same bicubic matrices, lax conv) for validation."""
    out_h, out_w = size_tensor.shape[-2], size_tensor.shape[-1]
    _, _, hin, win = x_nchw.shape
    mh = jnp.asarray(_bicubic_matrix(hin, out_h))
    mw = jnp.asarray(_bicubic_matrix(win, out_w))
    xr = jnp.einsum('oh,nchw->ncow', mh, x_nchw)
    xr = jnp.einsum('pw,ncow->ncop', mw, xr)

    def conv(inp, w, b, pad):
        y = jax.lax.conv_general_dilated(
            inp, w, window_strides=(1, 1), padding=[(pad, pad), (pad, pad)],
            dimension_numbers=('NCHW', 'OIHW', 'NCHW'))
        return y + b[None, :, None, None]

    h = jax.nn.relu(conv(xr, *params["conv1"], 4))
    h = jax.nn.relu(conv(h, *params["conv2"], 0))
    return conv(h, *params["conv3"], 2)


if __name__ == "__main__":
    xkey, _ = jax.random.split(jax.random.PRNGKey(0))
    # Small shapes: NCHW input like PyTorch; size_tensor only supplies its last two dims.
    x = jax.random.normal(xkey, (2, 3, 16, 16), dtype=jnp.float32)
    size_tensor = jnp.zeros((1, 1, 24, 24), dtype=jnp.float32)
    params = init_params(jax.random.PRNGKey(42))

    # tile_m=256 exercises the multi-tile grid path even at these toy shapes.
    out = strange_super_resolution_forward(params, x, size_tensor, tile_m=256)
    out = jax.block_until_ready(out)
    assert out.shape == (2, 3, 24, 24), out.shape

    ref = jax.block_until_ready(_reference_forward(params, x, size_tensor))
    max_err = float(jnp.max(jnp.abs(out - ref)))
    assert jnp.allclose(out, ref, atol=1e-3, rtol=1e-3), max_err

    print("KERNEL_OK")
</pallas_src>

<mosaic_0001>
module attributes {stable_mosaic.version = 11 : i64} {
  func.func @_resize_kernel(%arg0: i32, %arg1: memref<1x3x16x16xf32, #tpu.memory_space<vmem>>, %arg2: memref<24x16xf32, #tpu.memory_space<vmem>>, %arg3: memref<16x24xf32, #tpu.memory_space<vmem>>, %arg4: memref<1x3x24x24xf32, #tpu.memory_space<vmem>>) attributes {dimension_semantics = [#tpu.dimension_semantics<parallel>], iteration_bounds = array<i64: 2>, scalar_prefetch = 0 : i64, scratch_operands = 0 : i64, tpu.core_type = #tpu.core_type<tc>, window_params = [{transform_indices = @transform_0, window_bounds = array<i64: 1, 3, 16, 16>}, {pipeline_mode = #tpu.pipeline_mode<synchronous>, transform_indices = @transform_1, window_bounds = array<i64: 24, 16>}, {pipeline_mode = #tpu.pipeline_mode<synchronous>, transform_indices = @transform_2, window_bounds = array<i64: 16, 24>}, {transform_indices = @transform_3, window_bounds = array<i64: 1, 3, 24, 24>}]} {
    %c0 = arith.constant 0 : index
    %c0_0 = arith.constant 0 : index
    %0 = vector.load %arg2[%c0, %c0_0] : memref<24x16xf32, #tpu.memory_space<vmem>>, vector<24x16xf32>
    %c0_1 = arith.constant 0 : index
    %c0_2 = arith.constant 0 : index
    %c0_3 = arith.constant 0 : index
    %c0_4 = arith.constant 0 : index
    %1 = vector.load %arg1[%c0_1, %c0_2, %c0_3, %c0_4] : memref<1x3x16x16xf32, #tpu.memory_space<vmem>>, vector<1x1x16x16xf32>
    %2 = vector.shape_cast %1 : vector<1x1x16x16xf32> to vector<16x16xf32>
    %cst = arith.constant dense<0.000000e+00> : vector<24x16xf32>
    %3 = tpu.matmul %0, %2, %cst {dimension_numbers = #tpu.dot_dimension_numbers<[1], [0], [0], [1], [0, 0, 1, 1], [], []>} : vector<24x16xf32>, vector<16x16xf32>, vector<24x16xf32> -> vector<24x16xf32>
    %c0_5 = arith.constant 0 : index
    %c0_6 = arith.constant 0 : index
    %4 = vector.load %arg3[%c0_5, %c0_6] : memref<16x24xf32, #tpu.memory_space<vmem>>, vector<16x24xf32>
    %cst_7 = arith.constant dense<0.000000e+00> : vector<24x24xf32>
    %5 = tpu.matmul %3, %4, %cst_7 {dimension_numbers = #tpu.dot_dimension_numbers<[1], [0], [0], [1], [0, 0, 1, 1], [], []>} : vector<24x16xf32>, vector<16x24xf32>, vector<24x24xf32> -> vector<24x24xf32>
    %c0_8 = arith.constant 0 : index
    %c0_9 = arith.constant 0 : index
    %c0_10 = arith.constant 0 : index
    %c0_11 = arith.constant 0 : index
    %6 = vector.load %arg4[%c0_8, %c0_9, %c0_10, %c0_11] : memref<1x3x24x24xf32, #tpu.memory_space<vmem>>, vector<1x1x24x24xf32>
    %7 = vector.shape_cast %6 : vector<1x1x24x24xf32> to vector<24x24xf32>
    %8 = vector.shape_cast %5 : vector<24x24xf32> to vector<1x1x24x24xf32>
    tpu.vector_store %arg4[%c0_8, %c0_9, %c0_10, %c0_11], %8 {strides = array<i32>} : memref<1x3x24x24xf32, #tpu.memory_space<vmem>>, vector<1x1x24x24xf32>,
    %c0_12 = arith.constant 0 : index
    %c0_13 = arith.constant 0 : index
    %9 = vector.load %arg2[%c0_12, %c0_13] : memref<24x16xf32, #tpu.memory_space<vmem>>, vector<24x16xf32>
    %c0_14 = arith.constant 0 : index
    %c1 = arith.constant 1 : index
    %c0_15 = arith.constant 0 : index
    %c0_16 = arith.constant 0 : index
    %10 = vector.load %arg1[%c0_14, %c1, %c0_15, %c0_16] : memref<1x3x16x16xf32, #tpu.memory_space<vmem>>, vector<1x1x16x16xf32>
    %11 = vector.shape_cast %10 : vector<1x1x16x16xf32> to vector<16x16xf32>
    %cst_17 = arith.constant dense<0.000000e+00> : vector<24x16xf32>
    %12 = tpu.matmul %9, %11, %cst_17 {dimension_numbers = #tpu.dot_dimension_numbers<[1], [0], [0], [1], [0, 0, 1, 1], [], []>} : vector<24x16xf32>, vector<16x16xf32>, vector<24x16xf32> -> vector<24x16xf32>
    %c0_18 = arith.constant 0 : index
    %c0_19 = arith.constant 0 : index
    %13 = vector.load %arg3[%c0_18, %c0_19] : memref<16x24xf32, #tpu.memory_space<vmem>>, vector<16x24xf32>
    %cst_20 = arith.constant dense<0.000000e+00> : vector<24x24xf32>
    %14 = tpu.matmul %12, %13, %cst_20 {dimension_numbers = #tpu.dot_dimension_numbers<[1], [0], [0], [1], [0, 0, 1, 1], [], []>} : vector<24x16xf32>, vector<16x24xf32>, vector<24x24xf32> -> vector<24x24xf32>
    %c0_21 = arith.constant 0 : index
    %c1_22 = arith.constant 1 : index
    %c0_23 = arith.constant 0 : index
    %c0_24 = arith.constant 0 : index
    %15 = vector.load %arg4[%c0_21, %c1_22, %c0_23, %c0_24] : memref<1x3x24x24xf32, #tpu.memory_space<vmem>>, vector<1x1x24x24xf32>
    %16 = vector.shape_cast %15 : vector<1x1x24x24xf32> to vector<24x24xf32>
    %17 = vector.shape_cast %14 : vector<24x24xf32> to vector<1x1x24x24xf32>
    tpu.vector_store %arg4[%c0_21, %c1_22, %c0_23, %c0_24], %17 {strides = array<i32>} : memref<1x3x24x24xf32, #tpu.memory_space<vmem>>, vector<1x1x24x24xf32>,
    %c0_25 = arith.constant 0 : index
    %c0_26 = arith.constant 0 : index
    %18 = vector.load %arg2[%c0_25, %c0_26] : memref<24x16xf32, #tpu.memory_space<vmem>>, vector<24x16xf32>
    %c0_27 = arith.constant 0 : index
    %c2 = arith.constant 2 : index
    %c0_28 = arith.constant 0 : index
    %c0_29 = arith.constant 0 : index
    %19 = vector.load %arg1[%c0_27, %c2, %c0_28, %c0_29] : memref<1x3x16x16xf32, #tpu.memory_space<vmem>>, vector<1x1x16x16xf32>
    %20 = vector.shape_cast %19 : vector<1x1x16x16xf32> to vector<16x16xf32>
    %cst_30 = arith.constant dense<0.000000e+00> : vector<24x16xf32>
    %21 = tpu.matmul %18, %20, %cst_30 {dimension_numbers = #tpu.dot_dimension_numbers<[1], [0], [0], [1], [0, 0, 1, 1], [], []>} : vector<24x16xf32>, vector<16x16xf32>, vector<24x16xf32> -> vector<24x16xf32>
    %c0_31 = arith.constant 0 : index
    %c0_32 = arith.constant 0 : index
    %22 = vector.load %arg3[%c0_31, %c0_32] : memref<16x24xf32, #tpu.memory_space<vmem>>, vector<16x24xf32>
    %cst_33 = arith.constant dense<0.000000e+00> : vector<24x24xf32>
    %23 = tpu.matmul %21, %22, %cst_33 {dimension_numbers = #tpu.dot_dimension_numbers<[1], [0], [0], [1], [0, 0, 1, 1], [], []>} : vector<24x16xf32>, vector<16x24xf32>, vector<24x24xf32> -> vector<24x24xf32>
    %c0_34 = arith.constant 0 : index
    %c2_35 = arith.constant 2 : index
    %c0_36 = arith.constant 0 : index
    %c0_37 = arith.constant 0 : index
    %24 = vector.load %arg4[%c0_34, %c2_35, %c0_36, %c0_37] : memref<1x3x24x24xf32, #tpu.memory_space<vmem>>, vector<1x1x24x24xf32>
    %25 = vector.shape_cast %24 : vector<1x1x24x24xf32> to vector<24x24xf32>
    %26 = vector.shape_cast %23 : vector<24x24xf32> to vector<1x1x24x24xf32>
    tpu.vector_store %arg4[%c0_34, %c2_35, %c0_36, %c0_37], %26 {strides = array<i32>} : memref<1x3x24x24xf32, #tpu.memory_space<vmem>>, vector<1x1x24x24xf32>,
    return
  }
  func.func @transform_0(%arg0: i32) -> (i32, i32, i32, i32) {
    %c0_i32 = arith.constant 0 : i32
    %c0_i32_0 = arith.constant 0 : i32
    %c0_i32_1 = arith.constant 0 : i32
    %c0_i32_2 = arith.constant 0 : i32
    return %arg0, %c0_i32, %c0_i32_0, %c0_i32_1 : i32, i32, i32, i32
  }
  func.func @transform_1(%arg0: i32) -> (i32, i32) {
    %c0_i32 = arith.constant 0 : i32
    %c0_i32_0 = arith.constant 0 : i32
    %c0_i32_1 = arith.constant 0 : i32
    return %c0_i32, %c0_i32_0 : i32, i32
  }
  func.func @transform_2(%arg0: i32) -> (i32, i32) {
    %c0_i32 = arith.constant 0 : i32
    %c0_i32_0 = arith.constant 0 : i32
    %c0_i32_1 = arith.constant 0 : i32
    return %c0_i32, %c0_i32_0 : i32, i32
  }
  func.func @transform_3(%arg0: i32) -> (i32, i32, i32, i32) {
    %c0_i32 = arith.constant 0 : i32
    %c0_i32_0 = arith.constant 0 : i32
    %c0_i32_1 = arith.constant 0 : i32
    %c0_i32_2 = arith.constant 0 : i32
    return %arg0, %c0_i32, %c0_i32_0, %c0_i32_1 : i32, i32, i32, i32
  }
}

</mosaic_0001>

<bundles_post_ra>
// kernel: tpu_custom_call.1
= control target key start
LH: loop header
LB: loop body
LE: loop exit
PB: predicated region body
PF: predicated region fallthrough
CT: control target
= control target key end

     0   :  { %8 = vsyncpa [#allocation3], 0  ;;  %s1416_s0 = inlined_call_operand.hbm [shape: f32[2,3,16,16], index: 0, kind: input, shape index: {}]   ;;  %s1417_s1 = inlined_call_operand.vmem [shape: f32[24,16], index: 1, kind: input, shape index: {}]   ;;  %s1418_s2 = inlined_call_operand.vmem [shape: f32[16,24], index: 2, kind: input, shape index: {}]   ;;  %s1419_s3 = inlined_call_operand.hbm [shape: f32[2,3,24,24], index: 3, kind: output, shape index: {}]  }
   0x1   :  { %10 = vsyncpa [#allocation3 + $0x1], 0 }
   0x2   :  { %11 = vsyncpa [#allocation4], 0 }
   0x3   :  { %13 = vsyncpa [#allocation4 + $0x1], 0  ;;  %s1169_s12 = smov 0   ;;  %s1171_s13 = smov 0  }
   0x4   :  { %s1173_s14 = smov 0   ;;  %s1175_s15 = smov 0  }
   0x5 LB: > { %s1190_s16 = sadd.s32 4294967295, %s1139_s15   ;;  %s846_s17 = sadd.s32 4294967294, %s1139_s15   ;;  %s1139_s15 = sphi %s1175_s15, %s1433_s15   ;;  %s1135_s14 = sphi %s1173_s14, %s1432_s14   ;;  %s1131_s13 = sphi %s1171_s13, %s1431_s13   ;;  %s1127_s12 = sphi %s1169_s12, %s1430_s12  }
   0x6   : > { %s1194_s18 = sadd.s32 1, %s1139_s15   ;;  %s26_s19 = sadd.s32 1, %s1135_s14 }
   0x7   : > { %s23_s20 = ssub.s32 %s1139_s15, %s1194_s18  ;;  %p33_p0 = scmp.ne.s32.totalorder %s1135_s14, %s1131_s13 }
   0x8   : > { %p24_p1 = scmp.eq.s32.totalorder %s23_s20, 0  ;;  %p34_p2 = scmp.eq.s32.totalorder %s1139_s15, 0 }
   0x9   : > { %p39_p3 = scmp.ne.s32.totalorder %s1131_s13, %s1127_s12  ;;  %p40_p4 = scmp.eq.s32.totalorder %s1190_s16, 0 }
   0xa   : > { %s1206_s21 = scalar_select %p24_p1, %s1135_s14, %s26_s19  }
   0xb   : > { %p35_p5 = por %p34_p2, %p33_p0  ;;  %p1208_p6 = por %p40_p4, %p39_p3 }
   0xc   : > { %p105_p7 = scmp.eq.s32.totalorder %s1190_s16, 1  ;;  %p111_p8 = scmp.eq.s32.totalorder %s846_s17, 1 }
   0xd   : > { %s1422_s22 = scalar_select %p1208_p6, 1, 0 }
   0xe   : > { %p1007_p10 = scmp.lt.s32.totalorder %s1139_s15, 2  ;;  %p1215_p11 = por %p105_p7, %p33_p0 }
   0xf   : > { %p1219_p12 = por %p111_p8, %p39_p3  ;;  %s137_s25 = sand.u32 1, %s1135_s14  }
  0x10   : > { %s1423_s23 = scalar_select %p1215_p11, 1, 0 }
  0x11   : > { %s1424_s24 = scalar_select %p1219_p12, 1, 0 }
  0x12   : > { %s991_s26 = smul.u32 768, %s1139_s15  ;;  %p1230_p13 = pnand %p1007_p10, %p35_p5 }
  0x13   : > { %s990_s27 = smul.u32 48, %s137_s25  ;;  %s1236_s7 = scalar_lea.sflag [#allocation3], %s137_s25 }
  0x14   : > { %s1228_s30 = scalar_lea.hbm %s1416_s0, %s991_s26  ;;  %p1049_p1 = pneg %p1230_p13 }
  0x15   : > { %s141_s5 = scalar_lea.vmem [#allocation2], %s990_s27  ;;  %s1047_s8 = scalar_lea.hbm %s1228_s30, 768 }
  0x16   : > { %s148_s6 = sshll.u32 %s141_s5, 4  ;;  %p1048_p0 = scmp.ne.s32.totalorder %s1228_s30, %s1047_s8  ;;  %s1234_s6 = int_to_ptr.vmem [resolvable:$true] %s148_s6 }
  0x17   : > { %s1052_s11 = scalar_lea.hbm %s1416_s0, 1536  ;;  %p1053_p4 = scmp.lt.s32.totalorder %s1228_s30, %s1416_s0 }
  0x18   : > { %p1050_p2 = pnand %p1049_p1, %p1048_p0  ;;  %p1054_p5 = scmp.lt.s32.totalorder %s1052_s11, %s1047_s8 }
  0x1a   : > { %p1051_p3 = pneg %p1050_p2  ;;  %p1055_p7 = por %p1054_p5, %p1053_p4 }
  0x1c   : > { %p1056_p8 = pnand %p1055_p7, %p1051_p3 }
  0x1e   : > { %1059 = shalt.err (!%p1056_p8)
}
  0x1f   : > { %s1060_s20 = scalar_lea.vmem %s1234_s6, 768  ;;  %s1141_s25 = smov [#allocation2]  }
  0x20   : > { %p1061_p10 = scmp.ne.s32.totalorder %s1234_s6, %s1060_s20  ;;  %s1065_s26 = sshll.u32 %s1141_s25, 4  ;;  %s1066_s26 = int_to_ptr.vmem [resolvable:$false] %s1065_s26 }
  0x21   : > { %s1067_s27 = scalar_lea.vmem %s1066_s26, 1536  ;;  %p1068_p2 = scmp.lt.s32.totalorder %s1234_s6, %s1066_s26 }
  0x22   : > { %p1063_p9 = pnand %p1061_p10, %p1049_p1  ;;  %p1069_p12 = scmp.lt.s32.totalorder %s1067_s27, %s1060_s20 }
  0x24   : > { %p1064_p0 = pneg %p1063_p9  ;;  %p1070_p11 = por %p1069_p12, %p1068_p2 }
  0x26   : > { %p1071_p6 = pnand %p1070_p11, %p1064_p0 }
  0x28   : > { %1074 = shalt.err (!%p1071_p6)
}
  0x29   : > { %s1142_s28 = smov 128   ;;  %s1143_s29 = smov 8  }
  0x2a   : > { %1002 = dma.hbm_to_vmem [thread:$0]  (!%p1230_p13), %s1228_s30, 768, %s1234_s6, %s1236_s7, %s1142_s28, %s1142_s28, %s1143_s29  }
  0x2b   : > { %p850_p9 = scmp.ge.s32.totalorder %s1139_s15, 1  ;;  %p156_p1 = scmp.lt.s32.totalorder %s1139_s15, 3 }
  0x2d   : > { %p157_p3 = pnand %p850_p9, %p156_p1 }
  0x2e   : > { %s1260_s5 = sand.u32 (!%p157_p3), 1, %s1131_s13   ;;  %p1426_p6 = scmp.ne.s32.totalorder (!%p157_p3), %s1422_s22, 0 }
  0x2f   : > { %160 = sbr.rel (%p157_p3) target bundleno = 492 (0x1ec), region = 32  ;;  %s163_s9 = scalar_lea.sflag (!%p157_p3), [#allocation3], %s1260_s5 }
  0x30   : > { %s992_s8 = smul.u32 (!%p157_p3), 48, %s1260_s5 }
  0x32   : > { %s1264_s10 = scalar_lea.vmem (!%p157_p3), [#allocation2], %s992_s8 }
  0x34   : > { %1118 = dma.done.wait (%p1426_p6), %s163_s9, 768  }
  0x35   : > { %1120 = vsyncadd (%p1426_p6), %s163_s9, 4294966528  ;;  %v1144_v0 = vmov 0.0   ;;  %vm1145_vm0 = vmmov 0   ;;  %v193_v1 = vld [vmem:[%s1264_s10 + $0x8] sm:$0xff]  ;;  %v192_v2 = vld [vmem:[%s1264_s10] sm:$0xff]  ;;  %vm194_vm1 = vcmask 130048  }
  0x36   : > { %912 = vmatprep.subr.mxu0 %v1144_v0  ;;  %916 = vmatprep.mubr.msk.f32.mxu0 %vm1145_vm0, %v1144_v0  ;;  %v189_v3 = vld [vmem:[%s1417_s1] sm:$0xff]  ;;  %v858_v4 = vld [vmem:[%s1264_s10 + $0x18] sm:$0xff]  ;;  %v191_v8 = vld [vmem:[%s1417_s1 + $0x10] sm:$0xff]  ;;  %s993_s26 = smul.u32 72, %s1260_s5  ;;  %vm375_vm2 = vcmask 195584   ;;  %s760_s22 = scalar_lea.sflag [#allocation4], %s1260_s5 }
  0x37   : > { %925 = vmatprep.subr.mxu1 %v1144_v0  ;;  %929 = vmatprep.mubr.msk.f32.mxu1 %vm1145_vm0, %v1144_v0  ;;  %v285_v5 = vld [vmem:[%s1418_s2 + $0x8] sm:$0xff]  ;;  %v857_v6 = vld [vmem:[%s1264_s10 + $0x10] sm:$0xff]  ;;  %v868_v10 = vld [vmem:[%s1264_s10 + $0x20] sm:$0xff]  ;;  %s994_s29 = smul.u32 1152, %s1190_s16  ;;  %p1427_p12 = scmp.ne.s32.totalorder %s1423_s23, 0 }
  0x38   : > { %913 = vmatpush3.msra.mxu0 %v193_v1  ;;  %v190_v7 = vld [vmem:[%s1417_s1 + $0x8] sm:$0xff]  ;;  %926 = vmatpush3.msra.mxu1 %v285_v5  ;;  %v284_v11 = vld [vmem:[%s1418_s2] sm:$0xff]  ;;  %s188_s27 = scalar_lea.vmem [#allocation5], %s993_s26  ;;  %s1146_s30 = smov [#allocation5]  }
  0x39   : > { %914 = vmatprep.subr.mxu0 %v1144_v0  ;;  %927 = vmatprep.subr.mxu1 %v1144_v0  ;;  %v869_v9 = vld [vmem:[%s1264_s10 + $0x28] sm:$0xff]  ;;  %s773_s28 = sshll.u32 %s188_s27, 4  ;;  %s1372_s10 = scalar_lea.hbm %s1419_s3, %s994_s29  ;;  %s1366_s28 = int_to_ptr.vmem [resolvable:$true] %s773_s28 }
  0x3a   : > { %915 = vmatpush3.msra.mxu0 %v192_v2  ;;  %928 = vmatpush3.msra.mxu1 %v284_v11  ;;  %s1075_s16 = scalar_lea.vmem %s1366_s28, 1152  ;;  %s1079_s4 = sshll.u32 %s1146_s30, 4  ;;  %s1080_s4 = int_to_ptr.vmem [resolvable:$false] %s1079_s4 }
  0x3b   : > { %917 = vmatmul.mubr.msk.f32.vlgmr.msra.gmra.mxu0 %vm194_vm1, %v189_v3  ;;  %938 = vmatprep.subr.mxu0 %v1144_v0  ;;  %p1076_p11 = scmp.ne.s32.totalorder %s1366_s28, %s1075_s16  ;;  %s1081_s6 = scalar_lea.vmem %s1080_s4, 2304 }
  0x3c   : > { %939 = vmatpush3.msra.mxu0 %v858_v4  ;;  %919 = vmatprep.mubr.msk.f32.mxu0 %vm1145_vm0, %v1144_v0  ;;  %p1082_p5 = scmp.lt.s32.totalorder %s1366_s28, %s1080_s4  ;;  %p1083_p7 = scmp.lt.s32.totalorder %s1081_s6, %s1075_s16 }
  0x3d   : > { %940 = vmatprep.subr.mxu0 %v1144_v0  ;;  %951 = vmatprep.subr.mxu1 %v1144_v0  ;;  %p1077_p13 = pnand %p1076_p11, %p1427_p12 }
  0x3e   : > { %941 = vmatpush3.msra.mxu0 %v857_v6  ;;  %p1084_p8 = por %p1083_p7, %p1082_p5 }
  0x3f   : > { %920 = vmatmul.mubr.msk.f32.gmra.mxu0 %vm194_vm1, %v190_v7  ;;  %964 = vmatprep.subr.mxu0 %v1144_v0  ;;  %p1078_p4 = pneg %p1077_p13 }
  0x40   : > { %922 = vmatprep.mubr.msk.f32.mxu0 %vm1145_vm0, %v1144_v0 }
  0x41   : > { %p1085_p10 = pnand %p1084_p8, %p1078_p4 }
  0x43   : > { %923 = vmatmul.mubr.msk.f32.gmra.mxu0 %vm194_vm1, %v191_v8 }
  0x44   : > { %942 = vmatprep.mubr.msk.f32.mxu0 %vm1145_vm0, %v1144_v0 }
  0x47   : > { %943 = vmatmul.mubr.msk.f32.vlgmr.msra.gmra.mxu0 %vm194_vm1, %v189_v3 }
  0x48   : > { %965 = vmatpush3.msra.mxu0 %v869_v9  ;;  %945 = vmatprep.mubr.msk.f32.mxu0 %vm1145_vm0, %v1144_v0 }
  0x49   : > { %966 = vmatprep.subr.mxu0 %v1144_v0 }
  0x4a   : > { %967 = vmatpush3.msra.mxu0 %v868_v10 }
  0x4b   : > { %946 = vmatmul.mubr.msk.f32.gmra.mxu0 %vm194_vm1, %v190_v7 }
  0x4c   : > { %948 = vmatprep.mubr.msk.f32.mxu0 %vm1145_vm0, %v1144_v0 }
  0x4f   : > { %949 = vmatmul.mubr.msk.f32.gmra.mxu0 %vm194_vm1, %v191_v8 }
  0x50   : > { %968 = vmatprep.mubr.msk.f32.mxu0 %vm1145_vm0, %v1144_v0 }
  0x53   : > { %969 = vmatmul.mubr.msk.f32.vlgmr.msra.gmra.mxu0 %vm194_vm1, %v189_v3 }
  0x54   : > { %971 = vmatprep.mubr.msk.f32.mxu0 %vm1145_vm0, %v1144_v0 }
  0x57   : > { %972 = vmatmul.mubr.msk.f32.gmra.mxu0 %vm194_vm1, %v190_v7 }
  0x58   : > { %974 = vmatprep.mubr.msk.f32.mxu0 %vm1145_vm0, %v1144_v0 }
  0x5b   : > { %975 = vmatmul.mubr.msk.f32.gmra.mxu0 %vm194_vm1, %v191_v8 }
  0xfb   : > { %v270_v12 = vpop.f32.mrf.mxu0 }
  0xfc   : > { %930 = vmatmul.mubr.msk.f32.vlgmr.msra.gmra.mxu1 %vm194_vm1, %v270_v12 }
  0xfd   : > { %v918_v13 = vpop.f32.mrf.mxu0  ;;  %952 = vmatpush3.msra.mxu1 %v285_v5  ;;  %932 = vmatprep.mubr.msk.f32.mxu1 %vm1145_vm0, %v1144_v0 }
  0xfe   : > { %953 = vmatprep.subr.mxu1 %v1144_v0 }
  0xff   : > { %v275_v14 = vpop.f32.mrf.mxu0  ;;  %954 = vmatpush3.msra.mxu1 %v284_v11 }
 0x100   : > { %933 = vmatmul.mubr.msk.f32.gmra.mxu1 %vm194_vm1, %v275_v14  ;;  %977 = vmatprep.subr.mxu1 %v1144_v0 }
 0x101   : > { %v921_v15 = vpop.f32.mrf.mxu0  ;;  %935 = vmatprep.mubr.msk.f32.mxu1 %vm1145_vm0, %v1144_v0 }
 0x103   : > { %v280_v16 = vpop.f32.mrf.mxu0 }
 0x104   : > { %936 = vmatmul.mubr.msk.f32.gmra.mxu1 %vm194_vm1, %v280_v16 }
 0x105   : > { %v924_v17 = vpop.f32.mrf.mxu0  ;;  %955 = vmatprep.mubr.msk.f32.mxu1 %vm1145_vm0, %v1144_v0 }
 0x107   : > { %v460_v18 = vpop.f32.mrf.mxu0 }
 0x108   : > { %956 = vmatmul.mubr.msk.f32.vlgmr.msra.gmra.mxu1 %vm194_vm1, %v460_v18 }
 0x109   : > { %v944_v19 = vpop.f32.mrf.mxu0  ;;  %978 = vmatpush3.msra.mxu1 %v285_v5  ;;  %958 = vmatprep.mubr.msk.f32.mxu1 %vm1145_vm0, %v1144_v0 }
 0x10a   : > { %979 = vmatprep.subr.mxu1 %v1144_v0 }
 0x10b   : > { %v465_v20 = vpop.f32.mrf.mxu0  ;;  %980 = vmatpush3.msra.mxu1 %v284_v11 }
 0x10c   : > { %959 = vmatmul.mubr.msk.f32.gmra.mxu1 %vm194_vm1, %v465_v20 }
 0x10d   : > { %v947_v21 = vpop.f32.mrf.mxu0  ;;  %961 = vmatprep.mubr.msk.f32.mxu1 %vm1145_vm0, %v1144_v0 }
 0x10f   : > { %v470_v22 = vpop.f32.mrf.mxu0 }
 0x110   : > { %962 = vmatmul.mubr.msk.f32.gmra.mxu1 %vm194_vm1, %v470_v22 }
 0x111   : > { %v950_v23 = vpop.f32.mrf.mxu0  ;;  %981 = vmatprep.mubr.msk.f32.mxu1 %vm1145_vm0, %v1144_v0 }
 0x113   : > { %v650_v24 = vpop.f32.mrf.mxu0 }
 0x114   : > { %982 = vmatmul.mubr.msk.f32.vlgmr.msra.gmra.mxu1 %vm194_vm1, %v650_v24 }
 0x115   : > { %v970_v25 = vpop.f32.mrf.mxu0  ;;  %984 = vmatprep.mubr.msk.f32.mxu1 %vm1145_vm0, %v1144_v0 }
 0x117   : > { %v655_v26 = vpop.f32.mrf.mxu0 }
 0x118   : > { %985 = vmatmul.mubr.msk.f32.gmra.mxu1 %vm194_vm1, %v655_v26 }
 0x119   : > { %v973_v27 = vpop.f32.mrf.mxu0  ;;  %987 = vmatprep.mubr.msk.f32.mxu1 %vm1145_vm0, %v1144_v0 }
 0x11b   : > { %v660_v28 = vpop.f32.mrf.mxu0 }
 0x11c   : > { %988 = vmatmul.mubr.msk.f32.gmra.mxu1 %vm194_vm1, %v660_v28 }
 0x11d   : > { %v976_v29 = vpop.f32.mrf.mxu0 }
 0x1bc   : > { %v361_v30 = vpop.f32.mrf.mxu1 }
 0x1bd   : > { %376 = vst.msk [vmem:[%s188_s27] sm:$0xff] %vm375_vm2, %v361_v30 }
 0x1be   : > { %v931_v31 = vpop.f32.mrf.mxu1 }
 0x1c0   : > { %v366_v32 = vpop.f32.mrf.mxu1 }
 0x1c1   : > { %377 = vst.msk [vmem:[%s188_s27 + $0x8] sm:$0xff] %vm375_vm2, %v366_v32 }
 0x1c2   : > { %v934_v33 = vpop.f32.mrf.mxu1 }
 0x1c4   : > { %v371_v34 = vpop.f32.mrf.mxu1 }
 0x1c5   : > { %378 = vst.msk [vmem:[%s188_s27 + $0x10] sm:$0xff] %vm375_vm2, %v371_v34 }
 0x1c6   : > { %v937_v35 = vpop.f32.mrf.mxu1 }
 0x1c8   : > { %v551_v36 = vpop.f32.mrf.mxu1 }
 0x1c9   : > { %865 = vst.msk [vmem:[%s188_s27 + $0x18] sm:$0xff] %vm375_vm2, %v551_v36 }
 0x1ca   : > { %v957_v37 = vpop.f32.mrf.mxu1 }
 0x1cc   : > { %v556_v38 = vpop.f32.mrf.mxu1 }
 0x1cd   : > { %866 = vst.msk [vmem:[%s188_s27 + $0x20] sm:$0xff] %vm375_vm2, %v556_v38 }
 0x1ce   : > { %v960_v39 = vpop.f32.mrf.mxu1 }
 0x1d0   : > { %v561_v40 = vpop.f32.mrf.mxu1 }
 0x1d1   : > { %867 = vst.msk [vmem:[%s188_s27 + $0x28] sm:$0xff] %vm375_vm2, %v561_v40 }
 0x1d2   : > { %v963_v41 = vpop.f32.mrf.mxu1 }
 0x1d4   : > { %v741_v42 = vpop.f32.mrf.mxu1 }
 0x1d5   : > { %876 = vst.msk [vmem:[%s188_s27 + $0x30] sm:$0xff] %vm375_vm2, %v741_v42 }
 0x1d6   : > { %v983_v43 = vpop.f32.mrf.mxu1 }
 0x1d8   : > { %v746_v44 = vpop.f32.mrf.mxu1 }
 0x1d9   : > { %877 = vst.msk [vmem:[%s188_s27 + $0x38] sm:$0xff] %vm375_vm2, %v746_v44 }
 0x1da   : > { %v986_v45 = vpop.f32.mrf.mxu1 }
 0x1dc   : > { %v751_v46 = vpop.f32.mrf.mxu1 }
 0x1dd   : > { %878 = vst.msk [vmem:[%s188_s27 + $0x40] sm:$0xff] %vm375_vm2, %v751_v46 }
 0x1de   : > { %v989_v47 = vpop.f32.mrf.mxu1 }
 0x1df   : > { %1088 = shalt.err (!%p1085_p10)
}
 0x1e0   : > { %s1089_s7 = scalar_lea.hbm %s1372_s10, 1152  ;;  %s1093_s19 = scalar_lea.hbm %s1419_s3, 2304 }
 0x1e1   : > { %p1090_p0 = scmp.ne.s32.totalorder %s1372_s10, %s1089_s7  ;;  %p1094_p1 = scmp.lt.s32.totalorder %s1372_s10, %s1419_s3 }
 0x1e2   : > { %p1095_p3 = scmp.lt.s32.totalorder %s1093_s19, %s1089_s7 }
 0x1e3   : > { %p1091_p2 = pnand %p1090_p0, %p1427_p12 }
 0x1e4   : > { %p1096_p6 = por %p1095_p3, %p1094_p1 }
 0x1e5   : > { %p1092_p9 = pneg %p1091_p2 }
 0x1e7   : > { %p1097_p11 = pnand %p1096_p6, %p1092_p9 }
 0x1e9   : > { %1100 = shalt.err (!%p1097_p11)
}
 0x1ea   : > { %s1147_s26 = smov 128   ;;  %s1148_s27 = smov 8  }
 0x1eb   : > { %997 = dma.vmem_to_hbm [thread:$0]  (%p1427_p12), %s1366_s28, 1152, %s1372_s10, %s760_s22, %s1147_s26, %s1147_s26, %s1148_s27  }
 0x1ec PF: > { %s788_s29 = sand.u32 1, %s1127_s12   ;;  %p1428_p13 = scmp.ne.s32.totalorder %s1424_s24, 0 }
 0x1ed   : > { %p1429_p4 = scmp.ge.s32.totalorder %s1139_s15, 2  ;;  %s789_s8 = scalar_lea.sflag [#allocation4], %s788_s29 }
 0x1ef   : > { %p1004_p5 = pnand %p1429_p4, %p1428_p13 }
 0x1f1   : > { %p1005_p7 = pneg %p1004_p5 }
 0x1f3   : > { %1122 = dma.done.wait (%p1005_p7), %s789_s8, 1152  }
 0x1f4   : > { %1124 = vsyncadd (%p1005_p7), %s789_s8, 4294966144  ;;  %p16_p8 = scmp.ge.s32.totalorder %s1194_s18, 4   ;;  %s1430_s12 = smov %s1131_s13 }
 0x1f5   : > { %s1431_s13 = smov %s1135_s14  ;;  %s1432_s14 = smov %s1206_s21 }
 0x1f6   : > { %s1433_s15 = smov %s1194_s18  ;;  %18 = sbr.rel (!%p16_p8) target bundleno = 5 (0x5), region = 81 }
 0x1fb   :  { %794 = vsyncpa [#allocation3], 1 }
 0x1fc   :  { %796 = vsyncpa [#allocation3 + $0x1], 1 }
 0x1fd   :  { %797 = vsyncpa [#allocation4], 1 }
 0x1fe   :  { %799 = vsyncpa [#allocation4 + $0x1], 1 }

</bundles_post_ra>
